<compile_context>
chip_gen: v7x
topology: tpu7x:2x2x1
jax: 0.10.0
libtpu: 0.0.40
codegen_flags: <defaults>
</compile_context>

<pallas_src>
import numpy as np
import jax
import jax.numpy as jnp
from jax.experimental import pallas as pl
from jax.experimental.pallas import tpu as pltpu


# --------------------------------------------------------------------------
# helpers
# --------------------------------------------------------------------------
def _pick_spatial_tile(S, max_tile=2048):
    """Largest multiple-of-128 divisor of S that is <= max_tile, else S."""
    if S % 128 == 0:
        t = min(max_tile, S)
        t -= t % 128
        while t >= 128:
            if S % t == 0:
                return t
            t -= 128
    return S


def _pick_mode_tile(Y):
    """Modes per grid step: keep >=2 grid steps when possible (v7x dual TC)."""
    return Y // 2 if (Y % 2 == 0 and Y >= 2) else Y


def _pack_complex_weight(w):
    """(I, O, Y, 2) -> (Y, 2O, 2I) packed real W^T = [[wr^T, -wi^T], [wi^T, wr^T]]."""
    wr = jnp.transpose(w[..., 0], (2, 1, 0))      # (Y, O, I)
    wi = jnp.transpose(w[..., 1], (2, 1, 0))      # (Y, O, I)
    top = jnp.concatenate([wr, -wi], axis=-1)     # (Y, O, 2I)
    bot = jnp.concatenate([wi, wr], axis=-1)      # (Y, O, 2I)
    return jnp.concatenate([top, bot], axis=1).astype(jnp.float32)   # (Y, 2O, 2I)


# --------------------------------------------------------------------------
# Pallas kernel 1: complex mode mixing as one packed real matmul per mode.
#   out[y] = Wt[y] @ Xp[y]   with Xp (2I, R) rows = [Re; Im], R = batch*spatial
#   -> rows 0..O-1 of out are Re, rows O..2O-1 are Im.  R sits in lanes.
# --------------------------------------------------------------------------
def _complex_mix_kernel(x_ref, w_ref, o_ref):
    # x: (YT, 2I, R)   w: (YT, 2O, 2I)   o: (YT, 2O, R)
    o_ref[...] = jax.lax.dot_general(
        w_ref[...], x_ref[...],
        dimension_numbers=(((2,), (1,)), ((0,), (0,))),
        preferred_element_type=jnp.float32)


def complex_mode_mix(xp, wt):
    """xp: (Y, 2I, R) packed spectrum; wt: (Y, 2O, 2I) packed weight."""
    Y, I2, R = xp.shape
    O2 = wt.shape[1]
    YT = _pick_mode_tile(Y)
    cost = pl.CostEstimate(
        flops=2 * Y * O2 * I2 * R,
        transcendentals=0,
        bytes_accessed=4 * (Y * I2 * R + Y * O2 * I2 + Y * O2 * R))
    return pl.pallas_call(
        _complex_mix_kernel,
        out_shape=jax.ShapeDtypeStruct((Y, O2, R), jnp.float32),
        grid=(Y // YT,),
        in_specs=[pl.BlockSpec((YT, I2, R), lambda y: (y, 0, 0)),
                  pl.BlockSpec((YT, O2, I2), lambda y: (y, 0, 0))],
        out_specs=pl.BlockSpec((YT, O2, R), lambda y: (y, 0, 0)),
        compiler_params=pltpu.CompilerParams(dimension_semantics=("parallel",)),
        cost_estimate=cost,
    )(xp, wt)


# --------------------------------------------------------------------------
# Pallas kernel 2: fused residual add + backcast FF + forecast FF.
#   Inputs are channel-first slabs (B, C, S); per grid step the kernel sees a
#   (C, TS) tile, adds xx+xy once, and runs both FeedForwards
#   (Linear -> ReLU -> Linear -> LayerNorm, dropout p=0 => identity)
#   in channel-first form so the big spatial axis stays lane-dense.
# --------------------------------------------------------------------------
def _fused_ff_kernel(xx_ref, xy_ref,
                     w0b_ref, b0b_ref, w1b_ref, b1b_ref, gb_ref, bbb_ref,
                     w0f_ref, b0f_ref, w1f_ref, b1f_ref, gf_ref, bbf_ref,
                     ob_ref, of_ref):
    x = xx_ref[0] + xy_ref[0]                       # (C, TS): fused residual add

    def ff(w0t, b0, w1t, b1, g, beta):
        h = jnp.dot(w0t[...], x, preferred_element_type=jnp.float32) + b0[...]
        h = jnp.maximum(h, 0.0)                     # ReLU (dropout p=0 -> identity)
        y = jnp.dot(w1t[...], h, preferred_element_type=jnp.float32) + b1[...]
        mu = jnp.mean(y, axis=0, keepdims=True)     # LayerNorm over channel axis
        var = jnp.mean((y - mu) ** 2, axis=0, keepdims=True)   # biased, like torch
        yhat = (y - mu) * jax.lax.rsqrt(var + 1e-5)
        return yhat * g[...] + beta[...]

    ob_ref[0] = ff(w0b_ref, b0b_ref, w1b_ref, b1b_ref, gb_ref, bbb_ref).astype(ob_ref.dtype)
    of_ref[0] = ff(w0f_ref, b0f_ref, w1f_ref, b1f_ref, gf_ref, bbf_ref).astype(of_ref.dtype)


def fused_feedforward(xx_cf, xy_cf, back_params, fore_params, max_tile=2048):
    """xx_cf, xy_cf: (B, C, S) f32. Returns (backcast, forecast) each (B, C, S)."""
    B, C, S = xx_cf.shape
    H = back_params[0].shape[1]
    TS = _pick_spatial_tile(S, max_tile)
    grid = (B, S // TS)

    def cf(p):   # channel-first views of the (tiny) FF parameters
        w0, b0, w1, b1, g, beta = p
        return (w0.T, b0.T, w1.T, b1.T, g.T, beta.T)

    data_spec = pl.BlockSpec((1, C, TS), lambda b, s: (b, 0, s))
    out_spec = pl.BlockSpec((1, C, TS), lambda b, s: (b, 0, s))
    wspec = lambda shape: pl.BlockSpec(shape, lambda b, s: (0, 0))
    ff_specs = [wspec((H, C)), wspec((H, 1)), wspec((C, H)),
                wspec((C, 1)), wspec((C, 1)), wspec((C, 1))]

    rows = B * S
    cost = pl.CostEstimate(
        flops=8 * rows * H * C,                      # 2 FFs x 2 matmuls each
        transcendentals=2 * rows,                    # one rsqrt per column per FF
        bytes_accessed=4 * (4 * B * C * S + 2 * (2 * H * C + H + 3 * C)))

    return pl.pallas_call(
        _fused_ff_kernel,
        out_shape=(jax.ShapeDtypeStruct((B, C, S), jnp.float32),
                   jax.ShapeDtypeStruct((B, C, S), jnp.float32)),
        grid=grid,
        in_specs=[data_spec, data_spec] + ff_specs + ff_specs,
        out_specs=(out_spec, out_spec),
        compiler_params=pltpu.CompilerParams(
            dimension_semantics=("parallel", "parallel")),
        cost_estimate=cost,
    )(xx_cf, xy_cf, *cf(back_params), *cf(fore_params))


# --------------------------------------------------------------------------
# Full forward pass (mode='full', use_fork=True)
# --------------------------------------------------------------------------
def spectral_conv2d_forward(x, params, modes_x, modes_y):
    """x: (B, M, N, C) channel-last, matching the torch 'b m n i' convention."""
    B, M, N, I = x.shape
    O = I                                            # module ties in_dim == out_dim
    xc = jnp.transpose(x, (0, 3, 1, 2))              # (B, I, M, N)

    # ----- Fourier along y (last axis) -----
    # TODO(synk): rfft/irfft are done with jnp.fft (glue), not inside Pallas.
    x_fty = jnp.fft.rfft(xc, axis=-1, norm='ortho')            # (B, I, M, N//2+1)
    x_low = x_fty[..., :modes_y]                               # (B, I, M, my)
    xp = jnp.concatenate([jnp.real(x_low), jnp.imag(x_low)], axis=1)   # (B, 2I, M, my)
    xp = jnp.transpose(xp, (3, 1, 0, 2)).reshape(modes_y, 2 * I, B * M).astype(jnp.float32)
    oy = complex_mode_mix(xp, _pack_complex_weight(params['wy']))      # (my, 2O, B*M)
    oy = oy.reshape(modes_y, 2, O, B, M)
    oyc = (oy[:, 0] + 1j * oy[:, 1]).astype(jnp.complex64)     # (my, O, B, M)
    oyc = jnp.transpose(oyc, (2, 1, 3, 0))                     # (B, O, M, my)
    out_ft = jnp.zeros((B, O, M, N // 2 + 1), jnp.complex64).at[..., :modes_y].set(oyc)
    xy = jnp.fft.irfft(out_ft, n=N, axis=-1, norm='ortho')     # (B, O, M, N)

    # ----- Fourier along x (axis -2) -----
    x_ftx = jnp.fft.rfft(xc, axis=-2, norm='ortho')            # (B, I, M//2+1, N)
    x_low = x_ftx[:, :, :modes_x, :]                           # (B, I, mx, N)
    xp = jnp.concatenate([jnp.real(x_low), jnp.imag(x_low)], axis=1)   # (B, 2I, mx, N)
    xp = jnp.transpose(xp, (2, 1, 0, 3)).reshape(modes_x, 2 * I, B * N).astype(jnp.float32)
    ox = complex_mode_mix(xp, _pack_complex_weight(params['wx']))      # (mx, 2O, B*N)
    ox = ox.reshape(modes_x, 2, O, B, N)
    oxc = (ox[:, 0] + 1j * ox[:, 1]).astype(jnp.complex64)     # (mx, O, B, N)
    oxc = jnp.transpose(oxc, (2, 1, 0, 3))                     # (B, O, mx, N)
    out_ft = jnp.zeros((B, O, M // 2 + 1, N), jnp.complex64).at[:, :, :modes_x, :].set(oxc)
    xx = jnp.fft.irfft(out_ft, n=M, axis=-2, norm='ortho')     # (B, O, M, N)

    # ----- fused residual add + backcast/forecast FF (single Pallas call) -----
    S = M * N
    b_cf, f_cf = fused_feedforward(xx.reshape(B, O, S).astype(jnp.float32),
                                   xy.reshape(B, O, S).astype(jnp.float32),
                                   params['backcast'], params['forecast'])
    b = jnp.transpose(b_cf.reshape(B, O, M, N), (0, 2, 3, 1))   # (B, M, N, O)
    f = jnp.transpose(f_cf.reshape(B, O, M, N), (0, 2, 3, 1))   # use_fork=True
    return b, f


# --------------------------------------------------------------------------
# Pure-JAX reference (mirrors the PyTorch forward) for a sanity check
# --------------------------------------------------------------------------
def ref_forward(x, params, modes_x, modes_y):
    xc = jnp.transpose(x, (0, 3, 1, 2))
    B, I, M, N = xc.shape
    O = I
    wy = params['wy'][..., 0] + 1j * params['wy'][..., 1]
    wx = params['wx'][..., 0] + 1j * params['wx'][..., 1]

    x_fty = jnp.fft.rfft(xc, axis=-1, norm='ortho')
    out_ft = jnp.zeros((B, O, M, N // 2 + 1), jnp.complex64)
    out_ft = out_ft.at[..., :modes_y].set(
        jnp.einsum('bixy,ioy->boxy', x_fty[..., :modes_y], wy))
    xy = jnp.fft.irfft(out_ft, n=N, axis=-1, norm='ortho')

    x_ftx = jnp.fft.rfft(xc, axis=-2, norm='ortho')
    out_ft = jnp.zeros((B, O, M // 2 + 1, N), jnp.complex64)
    out_ft = out_ft.at[:, :, :modes_x, :].set(
        jnp.einsum('bixy,iox->boxy', x_ftx[:, :, :modes_x, :], wx))
    xx = jnp.fft.irfft(out_ft, n=M, axis=-2, norm='ortho')

    xf = jnp.transpose(xx + xy, (0, 2, 3, 1))

    def ff(v, p):
        w0, b0, w1, b1, g, beta = p
        h = jnp.maximum(v @ w0 + b0[0], 0.0)
        y = h @ w1 + b1[0]
        mu = jnp.mean(y, axis=-1, keepdims=True)
        var = jnp.mean((y - mu) ** 2, axis=-1, keepdims=True)
        return (y - mu) / jnp.sqrt(var + 1e-5) * g[0] + beta[0]

    rows = xf.reshape(-1, O)
    return (ff(rows, params['backcast']).reshape(B, M, N, O),
            ff(rows, params['forecast']).reshape(B, M, N, O))


# --------------------------------------------------------------------------
# Deterministic parameter init (shapes per SpectralConv2d.__init__)
# --------------------------------------------------------------------------
def init_params(key, in_dim, out_dim, modes_x, modes_y, factor):
    k = jax.random.split(key, 4)
    std_f = np.sqrt(2.0 / (in_dim + out_dim))  # xavier-normal style
    wx = (std_f * jax.random.normal(k[0], (in_dim, out_dim, modes_x, 2))).astype(jnp.float32)
    wy = (std_f * jax.random.normal(k[1], (in_dim, out_dim, modes_y, 2))).astype(jnp.float32)
    H = out_dim * factor

    def ff_params(kk):
        kk = jax.random.split(kk, 4)
        w0 = (jax.random.normal(kk[0], (out_dim, H)) / np.sqrt(out_dim)).astype(jnp.float32)
        b0 = (0.1 * jax.random.normal(kk[1], (1, H))).astype(jnp.float32)
        w1 = (jax.random.normal(kk[2], (H, out_dim)) / np.sqrt(H)).astype(jnp.float32)
        b1 = (0.1 * jax.random.normal(kk[3], (1, out_dim))).astype(jnp.float32)
        gamma = jnp.ones((1, out_dim), jnp.float32)
        beta = jnp.zeros((1, out_dim), jnp.float32)
        return (w0, b0, w1, b1, gamma, beta)

    return dict(wx=wx, wy=wy, backcast=ff_params(k[2]), forecast=ff_params(k[3]))


if __name__ == "__main__":
    # config: in_dim=out_dim=4, modes_x=modes_y=4, factor=2, n_ff_layers=2,
    #         layer_norm=True, use_fork=True, dropout=0.0, mode='full'
    B, M, N, C = 2, 16, 16, 4
    modes_x = modes_y = 4
    factor = 2

    key = jax.random.PRNGKey(0)
    kx, kp = jax.random.split(key)
    x = jax.random.normal(kx, (B, M, N, C), jnp.float32)
    params = init_params(kp, C, C, modes_x, modes_y, factor)

    b_out, f_out = spectral_conv2d_forward(x, params, modes_x, modes_y)
    b_out = jax.block_until_ready(b_out)
    f_out = jax.block_until_ready(f_out)

    b_ref, f_ref = ref_forward(x, params, modes_x, modes_y)
    np.testing.assert_allclose(np.asarray(b_out), np.asarray(b_ref), rtol=2e-2, atol=2e-2)
    np.testing.assert_allclose(np.asarray(f_out), np.asarray(f_ref), rtol=2e-2, atol=2e-2)

    print("KERNEL_OK")
</pallas_src>

<mosaic_0001>
module attributes {stable_mosaic.version = 11 : i64} {
  func.func @_complex_mix_kernel(%arg0: i32, %arg1: memref<2x8x32xf32, #tpu.memory_space<vmem>>, %arg2: memref<2x8x8xf32, #tpu.memory_space<vmem>>, %arg3: memref<2x8x32xf32, #tpu.memory_space<vmem>>) attributes {dimension_semantics = [#tpu.dimension_semantics<parallel>], iteration_bounds = array<i64: 2>, scalar_prefetch = 0 : i64, scratch_operands = 0 : i64, tpu.core_type = #tpu.core_type<tc>, window_params = [{transform_indices = @transform_0, window_bounds = array<i64: 2, 8, 32>}, {transform_indices = @transform_1, window_bounds = array<i64: 2, 8, 8>}, {transform_indices = @transform_2, window_bounds = array<i64: 2, 8, 32>}]} {
    %c0 = arith.constant 0 : index
    %c0_0 = arith.constant 0 : index
    %c0_1 = arith.constant 0 : index
    %0 = vector.load %arg2[%c0, %c0_0, %c0_1] : memref<2x8x8xf32, #tpu.memory_space<vmem>>, vector<2x8x8xf32>
    %c0_2 = arith.constant 0 : index
    %c0_3 = arith.constant 0 : index
    %c0_4 = arith.constant 0 : index
    %1 = vector.load %arg1[%c0_2, %c0_3, %c0_4] : memref<2x8x32xf32, #tpu.memory_space<vmem>>, vector<2x8x32xf32>
    %cst = arith.constant dense<0.000000e+00> : vector<2x8x32xf32>
    %2 = tpu.matmul %0, %1, %cst {dimension_numbers = #tpu.dot_dimension_numbers<[2], [1], [1], [2], [0, 0, 0, 1, 1, 2], [0], [0]>} : vector<2x8x8xf32>, vector<2x8x32xf32>, vector<2x8x32xf32> -> vector<2x8x32xf32>
    %c0_5 = arith.constant 0 : index
    %c0_6 = arith.constant 0 : index
    %c0_7 = arith.constant 0 : index
    %3 = vector.load %arg3[%c0_5, %c0_6, %c0_7] : memref<2x8x32xf32, #tpu.memory_space<vmem>>, vector<2x8x32xf32>
    tpu.vector_store %arg3[%c0_5, %c0_6, %c0_7], %2 {strides = array<i32>} : memref<2x8x32xf32, #tpu.memory_space<vmem>>, vector<2x8x32xf32>,
    return
  }
  func.func @transform_0(%arg0: i32) -> (i32, i32, i32) {
    %c0_i32 = arith.constant 0 : i32
    %c0_i32_0 = arith.constant 0 : i32
    %c0_i32_1 = arith.constant 0 : i32
    return %arg0, %c0_i32, %c0_i32_0 : i32, i32, i32
  }
  func.func @transform_1(%arg0: i32) -> (i32, i32, i32) {
    %c0_i32 = arith.constant 0 : i32
    %c0_i32_0 = arith.constant 0 : i32
    %c0_i32_1 = arith.constant 0 : i32
    return %arg0, %c0_i32, %c0_i32_0 : i32, i32, i32
  }
  func.func @transform_2(%arg0: i32) -> (i32, i32, i32) {
    %c0_i32 = arith.constant 0 : i32
    %c0_i32_0 = arith.constant 0 : i32
    %c0_i32_1 = arith.constant 0 : i32
    return %arg0, %c0_i32, %c0_i32_0 : i32, i32, i32
  }
}

</mosaic_0001>

<bundles_post_ra>
// kernel: tpu_custom_call.1
= control target key start
LH: loop header
LB: loop body
LE: loop exit
PB: predicated region body
PF: predicated region fallthrough
CT: control target
= control target key end

     0   :  { %7 = vsyncpa [#allocation3], 0  ;;  %s942_s0 = inlined_call_operand.hbm [shape: f32[4,8,32], index: 0, kind: input, shape index: {}]   ;;  %s943_s1 = inlined_call_operand.hbm [shape: f32[4,8,8], index: 1, kind: input, shape index: {}]   ;;  %s944_s2 = inlined_call_operand.hbm [shape: f32[4,8,32], index: 2, kind: output, shape index: {}]  }
   0x1   :  { %9 = vsyncpa [#allocation3 + $0x1], 0 }
   0x2   :  { %10 = vsyncpa [#allocation6], 0 }
   0x3   :  { %12 = vsyncpa [#allocation6 + $0x1], 0 }
   0x4   :  { %13 = vsyncpa [#allocation4], 0 }
   0x5   :  { %15 = vsyncpa [#allocation4 + $0x1], 0  ;;  %s719_s9 = smov 0   ;;  %s721_s10 = smov 0  }
   0x6   :  { %s723_s11 = smov 0   ;;  %s725_s12 = smov 0  }
   0x7 LB: > { %s740_s13 = sadd.s32 4294967295, %s693_s12   ;;  %s469_s14 = sadd.s32 4294967294, %s693_s12   ;;  %s693_s12 = sphi %s725_s12, %s960_s12   ;;  %s689_s11 = sphi %s723_s11, %s959_s11   ;;  %s685_s10 = sphi %s721_s10, %s958_s10   ;;  %s681_s9 = sphi %s719_s9, %s957_s9  }
   0x8   : > { %s744_s15 = sadd.s32 1, %s693_s12   ;;  %s28_s16 = sadd.s32 1, %s689_s11 }
   0x9   : > { %s25_s17 = ssub.s32 %s693_s12, %s744_s15  ;;  %p35_p0 = scmp.ne.s32.totalorder %s689_s11, %s685_s10 }
   0xa   : > { %p26_p1 = scmp.eq.s32.totalorder %s25_s17, 0  ;;  %p36_p2 = scmp.eq.s32.totalorder %s693_s12, 0 }
   0xb   : > { %p41_p3 = scmp.ne.s32.totalorder %s685_s10, %s681_s9  ;;  %p42_p4 = scmp.eq.s32.totalorder %s740_s13, 0 }
   0xc   : > { %s756_s18 = scalar_select %p26_p1, %s689_s11, %s28_s16  }
   0xd   : > { %p758_p5 = por %p36_p2, %p35_p0  ;;  %p762_p6 = por %p42_p4, %p41_p3 }
   0xe   : > { %p91_p7 = scmp.eq.s32.totalorder %s740_s13, 1  ;;  %p97_p8 = scmp.eq.s32.totalorder %s469_s14, 1 }
   0xf   : > { %s948_s20 = scalar_select %p762_p6, 1, 0 }
  0x10   : > { %p523_p10 = scmp.lt.s32.totalorder %s693_s12, 2  ;;  %p769_p11 = por %p91_p7, %p35_p0 }
  0x11   : > { %p773_p12 = por %p97_p8, %p41_p3  ;;  %s778_s23 = sand.u32 1, %s689_s11  }
  0x12   : > { %s949_s21 = scalar_select %p769_p11, 1, 0 }
  0x13   : > { %s950_s22 = scalar_select %p773_p12, 1, 0 }
  0x14   : > { %s489_s24 = sshll.u32 %s693_s12, 8  ;;  %s472_s25 = sshll.u32 %s778_s23, 4 }
  0x15   : > { %s787_s28 = scalar_lea.hbm %s942_s0, %s489_s24  ;;  %s121_s29 = scalar_lea.vmem [#allocation2], %s472_s25 }
  0x16   : > { %s128_s30 = sshll.u32 %s121_s29, 4  ;;  %p793_p13 = pnand %p523_p10, %p758_p5  ;;  %s797_s30 = int_to_ptr.vmem [resolvable:$true] %s128_s30 }
  0x17   : > { %s118_s4 = scalar_lea.sflag [#allocation3], %s778_s23  ;;  %s563_s5 = scalar_lea.hbm %s787_s28, 256 }
  0x18   : > { %p564_p0 = scmp.ne.s32.totalorder %s787_s28, %s563_s5  ;;  %p565_p1 = pneg %p793_p13 }
  0x19   : > { %s568_s8 = scalar_lea.hbm %s942_s0, 512  ;;  %p569_p4 = scmp.lt.u32.totalorder %s787_s28, %s942_s0 }
  0x1a   : > { %p566_p2 = pnand %p565_p1, %p564_p0  ;;  %p570_p5 = scmp.lt.u32.totalorder %s568_s8, %s563_s5 }
  0x1b   : > { %p572_p8 = scmp.lt.u32.totalorder %s563_s5, %s787_s28 }
  0x1c   : > { %p567_p3 = pneg %p566_p2  ;;  %p571_p7 = por %p570_p5, %p569_p4 }
  0x1e   : > { %p573_p10 = por %p572_p8, %p571_p7 }
  0x20   : > { %p574_p9 = pnand %p573_p10, %p567_p3 }
  0x22   : > { %577 = shalt.err (!%p574_p9)
}
  0x23   : > { %s578_s17 = scalar_lea.vmem %s797_s30, 256  ;;  %s695_s19 = smov [#allocation2]  }
  0x24   : > { %p579_p0 = scmp.ne.s32.totalorder %s797_s30, %s578_s17  ;;  %s583_s26 = sshll.u32 %s695_s19, 4  ;;  %s584_s26 = int_to_ptr.vmem [resolvable:$false] %s583_s26 }
  0x25   : > { %s585_s27 = scalar_lea.vmem %s584_s26, 512  ;;  %p586_p11 = scmp.lt.s32.totalorder %s797_s30, %s584_s26 }
  0x26   : > { %p581_p2 = pnand %p579_p0, %p565_p1  ;;  %p587_p4 = scmp.lt.s32.totalorder %s585_s27, %s578_s17 }
  0x28   : > { %p582_p12 = pneg %p581_p2  ;;  %p588_p5 = por %p587_p4, %p586_p11 }
  0x2a   : > { %p589_p7 = pnand %p588_p5, %p582_p12 }
  0x2c   : > { %592 = shalt.err (!%p589_p7)
}
  0x2d   : > { %s696_s29 = smov 128   ;;  %s697_s5 = smov 8  }
  0x2e   : > { %515 = dma.hbm_to_vmem [thread:$0]  (!%p793_p13), %s787_s28, 256, %s797_s30, %s118_s4, %s696_s29, %s696_s29, %s697_s5  }
  0x2f   : > { %p478_p9 = scmp.ge.s32.totalorder %s693_s12, 1  ;;  %p157_p11 = scmp.lt.s32.totalorder %s693_s12, 3 }
  0x30   : > { %s841_s14 = scalar_lea.hbm %s943_s1, %s489_s24  ;;  %s142_s16 = scalar_lea.vmem [#allocation5], %s472_s25 }
  0x31   : > { %p832_p12 = pnand %p478_p9, %p157_p11  ;;  %s149_s17 = sshll.u32 %s142_s16, 4  ;;  %s845_s17 = int_to_ptr.vmem [resolvable:$true] %s149_s17 }
  0x32   : > { %s139_s28 = scalar_lea.sflag [#allocation6], %s778_s23  ;;  %s593_s30 = scalar_lea.hbm %s841_s14, 256 }
  0x33   : > { %p594_p3 = scmp.ne.s32.totalorder %s841_s14, %s593_s30  ;;  %s598_s24 = scalar_lea.hbm %s943_s1, 512 }
  0x34   : > { %p599_p0 = scmp.lt.u32.totalorder %s841_s14, %s943_s1  ;;  %p600_p2 = scmp.lt.u32.totalorder %s598_s24, %s593_s30 }
  0x35   : > { %p596_p8 = pnand %p594_p3, %p565_p1  ;;  %p602_p5 = scmp.lt.u32.totalorder %s593_s30, %s841_s14 }
  0x36   : > { %p601_p4 = por %p600_p2, %p599_p0 }
  0x37   : > { %p597_p10 = pneg %p596_p8 }
  0x38   : > { %p603_p7 = por %p602_p5, %p601_p4 }
  0x3a   : > { %p604_p9 = pnand %p603_p7, %p597_p10 }
  0x3c   : > { %607 = shalt.err (!%p604_p9)
}
  0x3d   : > { %s608_s25 = scalar_lea.vmem %s845_s17, 256  ;;  %s698_s7 = smov [#allocation5]  }
  0x3e   : > { %p609_p11 = scmp.ne.s32.totalorder %s845_s17, %s608_s25  ;;  %s613_s8 = sshll.u32 %s698_s7, 4  ;;  %s614_s8 = int_to_ptr.vmem [resolvable:$false] %s613_s8 }
  0x3f   : > { %s615_s16 = scalar_lea.vmem %s614_s8, 512  ;;  %p616_p6 = scmp.lt.s32.totalorder %s845_s17, %s614_s8 }
  0x40   : > { %p611_p3 = pnand %p609_p11, %p565_p1  ;;  %p617_p0 = scmp.lt.s32.totalorder %s615_s16, %s608_s25 }
  0x42   : > { %p612_p8 = pneg %p611_p3  ;;  %p618_p2 = por %p617_p0, %p616_p6 }
  0x44   : > { %p619_p4 = pnand %p618_p2, %p612_p8 }
  0x46   : > { %622 = shalt.err (!%p619_p4)
}
  0x47   : > { %518 = dma.hbm_to_vmem [thread:$0]  (!%p793_p13), %s841_s14, 256, %s845_s17, %s139_s28, %s696_s29, %s696_s29, %s697_s5  }
  0x48   : > { %161 = sbr.rel (%p832_p12) target bundleno = 313 (0x139), region = 28  ;;  %s879_s30 = sand.u32 (!%p832_p12), 1, %s685_s10  }
  0x49   : > { %s479_s4 = sshll.u32 (!%p832_p12), %s879_s30, 4  ;;  %s164_s19 = scalar_lea.sflag (!%p832_p12), [#allocation3], %s879_s30 }
  0x4a   : > { %s167_s3 = scalar_lea.vmem (!%p832_p12), [#allocation2], %s479_s4  ;;  %p953_p6 = scmp.ne.s32.totalorder (!%p832_p12), %s948_s20, 0 }
  0x4f   : > { %668 = dma.done.wait (%p953_p6), %s164_s19, 256  }
  0x50   : > { %670 = vsyncadd (%p953_p6), %s164_s19, 4294967040  ;;  %s173_s23 = scalar_lea.sflag [#allocation6], %s879_s30  ;;  %s176_s29 = scalar_lea.vmem [#allocation5], %s479_s4 }
  0x51   : > { %672 = dma.done.wait (%p953_p6), %s173_s23, 256  }
  0x52   : > { %674 = vsyncadd (%p953_p6), %s173_s23, 4294967040  ;;  %v699_v0 = vmov 0.0   ;;  %vm700_vm0 = vmmov 0   ;;  %vm209_vm1 = vcmask 64512   ;;  %v207_v1 = vld [vmem:[%s167_s3] sm:$0xff]  ;;  %v208_v2 = vld [vmem:[%s167_s3 + $0x8] sm:$0xff] }
  0x53   : > { %496 = vmatprep.subr.mxu0 %v699_v0  ;;  %501 = vmatprep.subr.mxu1 %v699_v0  ;;  %v205_v3 = vld [vmem:[%s176_s29] sm:$0xff]  ;;  %v206_v4 = vld [vmem:[%s176_s29 + $0x8] sm:$0xff]  ;;  %s201_s20 = scalar_lea.vmem [#allocation7], %s479_s4  ;;  %s491_s6 = sshll.u32 %s740_s13, 8  ;;  %vm356_vm2 = vcmask 261120  }
  0x54   : > { %498 = vmatprep.mubr.msk.f32.mxu0 %vm700_vm0, %v699_v0  ;;  %503 = vmatprep.mubr.msk.f32.mxu1 %vm700_vm0, %v699_v0  ;;  %s373_s5 = sshll.u32 %s201_s20, 4  ;;  %s898_s28 = scalar_lea.hbm %s944_s2, %s491_s6  ;;  %s893_s5 = int_to_ptr.vmem [resolvable:$true] %s373_s5 }
  0x55   : > { %497 = vmatpush3.msra.mxu0 %v207_v1  ;;  %502 = vmatpush3.msra.mxu1 %v208_v2  ;;  %s360_s24 = scalar_lea.sflag [#allocation4], %s879_s30  ;;  %s623_s26 = scalar_lea.vmem %s893_s5, 256 }
  0x56   : > { %499 = vmatmul.mubr.msk.f32.vlgmr.msra.gmra.mrb[0].mxu0 %vm209_vm1, %v205_v3  ;;  %504 = vmatmul.mubr.msk.f32.vlgmr.msra.gmra.mrb[0].mxu1 %vm209_vm1, %v206_v4  ;;  %p624_p13 = scmp.ne.s32.totalorder %s893_s5, %s623_s26  ;;  %p954_p1 = scmp.ne.s32.totalorder %s949_s21, 0 }
  0x57   : > { %s701_s13 = smov [#allocation7]  }
  0x58   : > { %p625_p12 = pnand %p624_p13, %p954_p1  ;;  %s627_s27 = sshll.u32 %s701_s13, 4  ;;  %s628_s27 = int_to_ptr.vmem [resolvable:$false] %s627_s27 }
  0x59   : > { %s629_s25 = scalar_lea.vmem %s628_s27, 512  ;;  %p630_p5 = scmp.lt.s32.totalorder %s893_s5, %s628_s27 }
  0x5a   : > { %p626_p10 = pneg %p625_p12  ;;  %p631_p7 = scmp.lt.s32.totalorder %s629_s25, %s623_s26 }
  0x5c   : > { %p632_p9 = por %p631_p7, %p630_p5 }
  0x5e   : > { %p633_p11 = pnand %p632_p9, %p626_p10 }
 0x129   : > { %v279_v5 = vpop.f32.mrb[0].mxu0  ;;  %v352_v6 = vpop.f32.mrb[0].mxu1 }
 0x12a   : > { %357 = vst.msk [vmem:[%s201_s20] sm:$0xff] %vm356_vm2, %v279_v5  ;;  %358 = vst.msk [vmem:[%s201_s20 + $0x8] sm:$0xff] %vm356_vm2, %v352_v6  ;;  %v500_v7 = vpop.f32.mrb[1].mxu0  ;;  %v505_v8 = vpop.f32.mrb[1].mxu1 }
 0x12b   : > { %636 = shalt.err (!%p633_p11)
}
 0x12c   : > { %s637_s7 = scalar_lea.hbm %s898_s28, 256  ;;  %s641_s4 = scalar_lea.hbm %s944_s2, 512 }
 0x12d   : > { %p638_p3 = scmp.ne.s32.totalorder %s898_s28, %s637_s7  ;;  %p642_p2 = scmp.lt.u32.totalorder %s898_s28, %s944_s2 }
 0x12e   : > { %p643_p4 = scmp.lt.u32.totalorder %s641_s4, %s637_s7  ;;  %p645_p13 = scmp.lt.u32.totalorder %s637_s7, %s898_s28 }
 0x12f   : > { %p639_p8 = pnand %p638_p3, %p954_p1 }
 0x130   : > { %p644_p6 = por %p643_p4, %p642_p2 }
 0x131   : > { %p640_p0 = pneg %p639_p8 }
 0x132   : > { %p646_p12 = por %p645_p13, %p644_p6 }
 0x134   : > { %p647_p10 = pnand %p646_p12, %p640_p0 }
 0x136   : > { %650 = shalt.err (!%p647_p10)
}
 0x137   : > { %s702_s23 = smov 128   ;;  %s703_s29 = smov 8  }
 0x138   : > { %510 = dma.vmem_to_hbm [thread:$0]  (%p954_p1), %s893_s5, 256, %s898_s28, %s360_s24, %s702_s23, %s702_s23, %s703_s29  }
 0x139 PF: > { %s388_s20 = sand.u32 1, %s681_s9   ;;  %p955_p5 = scmp.ne.s32.totalorder %s950_s22, 0 }
 0x13a   : > { %p956_p7 = scmp.ge.s32.totalorder %s693_s12, 2  ;;  %s389_s6 = scalar_lea.sflag [#allocation4], %s388_s20 }
 0x13c   : > { %p520_p9 = pnand %p956_p7, %p955_p5 }
 0x13e   : > { %676 = dma.done.wait (!%p520_p9), %s389_s6, 256  }
 0x13f   : > { %678 = vsyncadd (!%p520_p9), %s389_s6, 4294967040  ;;  %p18_p11 = scmp.ge.s32.totalorder %s744_s15, 4   ;;  %s957_s9 = smov %s685_s10 }
 0x140   : > { %s958_s10 = smov %s689_s11  ;;  %s959_s11 = smov %s756_s18 }
 0x141   : > { %s960_s12 = smov %s744_s15  ;;  %20 = sbr.rel (!%p18_p11) target bundleno = 7 (0x7), region = 86 }
 0x148   :  { %394 = vsyncpa [#allocation3], 1 }
 0x149   :  { %396 = vsyncpa [#allocation3 + $0x1], 1 }
 0x14a   :  { %397 = vsyncpa [#allocation6], 1 }
 0x14b   :  { %399 = vsyncpa [#allocation6 + $0x1], 1 }
 0x14c   :  { %400 = vsyncpa [#allocation4], 1 }
 0x14d   :  { %402 = vsyncpa [#allocation4 + $0x1], 1 }

</bundles_post_ra>
